<compile_context>
chip_gen: v6e
topology: v6e:2x2x1
jax: 0.10.0
libtpu: 0.0.40
codegen_flags: <defaults>
</compile_context>

<pallas_src>
import functools

import numpy as np
import jax
import jax.numpy as jnp
from jax import lax
from jax.experimental import pallas as pl
from jax.experimental.pallas import tpu as pltpu

try:
    from scipy.optimize import linear_sum_assignment as _lsa
except Exception:  # pragma: no cover
    _lsa = None  # TODO(synk): scipy Hungarian unavailable; greedy fallback approximates linear_sum_assignment.

# ---------------------------------------------------------------------------
# TrajParamIndex (layout of the per-trajectory parameter vector)
# ---------------------------------------------------------------------------
X, Y, Z = 0, 1, 2
VX, VY = 3, 4
LENGTH, WIDTH, HEIGHT = 5, 6, 7
HAS_OBJECT = 8
END_OF_INDEX = 12  # 3 extra attribute channels after HAS_OBJECT

# TODO(synk): has_object_loss / regression_loss are registry-built in the
# original; assumed sigmoid focal (alpha=0.25, gamma=2) and L1, mean reduction.
ALPHA = 0.25
GAMMA = 2.0  # gamma == 2 -> implemented as x*x (no transcendental pow)

_REG_CHANNEL_WEIGHTS = (
    (X, 0.7), (Y, 0.7), (Z, 0.7),
    (VX, 0.2), (VY, 0.2),
    (LENGTH, 0.1), (WIDTH, 0.1), (HEIGHT, 0.1),
)
# one-to-N matching cost uses X, Y, Z and LENGTH..HEIGHT (no velocity)
_CT_COST_CHANNELS = (X, Y, Z, LENGTH, WIDTH, HEIGHT)


# ---------------------------------------------------------------------------
# In-kernel helpers (2-D ops only; proven to lower on Mosaic)
# ---------------------------------------------------------------------------
def _softplus(x):
    """Numerically stable softplus built from exp/log/abs/max (VPU+EUP)."""
    return jnp.maximum(x, 0.0) + jnp.log(1.0 + jnp.exp(-jnp.abs(x)))


def _focal_elem(x, t):
    """Per-element sigmoid focal loss from logits (alpha=0.25, gamma=2)."""
    p = jax.nn.sigmoid(x)
    # BCE-with-logits: -[t*log(p) + (1-t)*log(1-p)] via softplus (stable).
    ce = t * _softplus(-x) + (1.0 - t) * _softplus(x)
    p_t = p * t + (1.0 - p) * (1.0 - t)
    one_m = 1.0 - p_t
    a_t = ALPHA * t + (1.0 - ALPHA) * (1.0 - t)
    return a_t * one_m * one_m * ce          # gamma=2 -> square, no pow


def _l1_group(g, pt, lo, hi):
    """Sum_{c in [lo, hi]} |g[:, c, None] - pt[None, c, :]|  ->  (M, N)."""
    acc = None
    for c in range(lo, hi + 1):
        d = jnp.abs(g[:, c:c + 1] - pt[c:c + 1, :])
        acc = d if acc is None else acc + d
    return acc


# ---------------------------------------------------------------------------
# Pallas kernels
# ---------------------------------------------------------------------------
def _hungarian_cost_kernel(gt_ref, predt_ref, out_ref, *, cls_w, reg_w,
                           use_normalized):
    """One (layer, batch) tile of the Hungarian matching cost: (M, N)."""
    g = gt_ref[0]          # (M, C)   gt params, M on sublanes
    pt = predt_ref[0, 0]   # (C, N)   pred params, N on lanes

    if use_normalized:
        center = _l1_group(g, pt, X, Z)
        vel = _l1_group(g, pt, VX, VY)
        dim = _l1_group(g, pt, LENGTH, HEIGHT)
        center = 1.0 - jnp.exp(-center / 30.0)
        vel = 0.5 * (1.0 + jnp.tanh(10.0 * (vel - 2.0)))
        dim = 0.5 * (1.0 + jnp.tanh(10.0 * (dim - 2.0)))
        reg_cost = 0.7 * center + 0.2 * vel + 0.1 * dim
    else:
        # Fold the 0.7 / 0.2 / 0.1 section weights into the per-channel
        # accumulation: one fused pass, no extra full-tile scale/add ops.
        reg_cost = None
        for c, wc in _REG_CHANNEL_WEIGHTS:
            d = jnp.abs(g[:, c:c + 1] - pt[c:c + 1, :]) * wc
            reg_cost = d if reg_cost is None else reg_cost + d

    # Focal classification cost (gamma=2 -> squares; softplus-based logs).
    x = pt[HAS_OBJECT:HAS_OBJECT + 1, :]          # (1, N) logits
    p = jax.nn.sigmoid(x)
    neg = (1.0 - ALPHA) * (p * p) * _softplus(x)          # -log(1 - p)
    pos = ALPHA * ((1.0 - p) * (1.0 - p)) * _softplus(-x)  # -log(p)
    gt_obj = g[:, HAS_OBJECT:HAS_OBJECT + 1]      # (M, 1), values exactly 0/1
    cls_cost = jnp.where(gt_obj > 0.5, pos, neg)  # broadcast -> (M, N)

    out_ref[0, 0] = cls_cost * cls_w + reg_cost * reg_w


def _decoder_losses_kernel(pred_ref, gt_ref, mask_ref, out_ref):
    """All decoder-layer loss reductions; out_ref is SMEM (L, 3):
       [:, 0] full focal obj loss, [:, 1] matched-only focal obj loss,
       [:, 2] matched-only L1 regression loss."""
    L = pred_ref.shape[0]
    R = pred_ref.shape[1]
    n_reg = HEIGHT - X + 1
    for l in range(L):
        x = pred_ref[l]      # (R, C)
        t = gt_ref[l]        # (R, C)
        m = mask_ref[l]      # (R, 1)  matched mask (0/1)

        last = (HAS_OBJECT + 1) if l == 0 else END_OF_INDEX
        k_full = last - HAS_OBJECT
        fl_full = _focal_elem(x[:, HAS_OBJECT:last], t[:, HAS_OBJECT:last])
        out_ref[l, 0] = jnp.sum(fl_full) / float(R * k_full)

        msum = jnp.sum(m)
        fl_pos = _focal_elem(x[:, HAS_OBJECT:HAS_OBJECT + 1],
                             t[:, HAS_OBJECT:HAS_OBJECT + 1])
        out_ref[l, 1] = jnp.sum(fl_pos * m) / jnp.maximum(msum, 1.0)

        l1 = jnp.abs(x[:, X:HEIGHT + 1] - t[:, X:HEIGHT + 1]) * m
        out_ref[l, 2] = jnp.sum(l1) / jnp.maximum(msum * float(n_reg), 1.0)


def _ct_losses_kernel(valid_ref, gt_ref, predt_ref, out_ref, *, ct_thresh):
    """Fused one-to-N matching + ct losses for all c_output layers.
       out_ref is SMEM (Lc, 3): [cls_loss_ct, reg_loss_ct, fp_cls_loss_ct]."""
    Lc = predt_ref.shape[0]
    B = predt_ref.shape[1]
    M = gt_ref.shape[1]
    N = predt_ref.shape[3]
    n_reg = float(HEIGHT - X + 1)

    for l in range(Lc):
        cls_num = 0.0
        cls_den = 0.0
        reg_num = 0.0
        reg_den = 0.0
        fp_num = 0.0
        fp_den = 0.0
        for b in range(B):
            g = gt_ref[b]            # (M, C)
            pt = predt_ref[l, b]     # (C, N)
            nb = valid_ref[b]        # number of valid GT rows (int32 scalar)

            # Shared pairwise |diff| terms: the matching cost (X,Y,Z,L,W,H)
            # and the full X..HEIGHT L1 used by the ct regression loss.
            cost = None
            l1_all = None
            for c in range(X, HEIGHT + 1):
                d = jnp.abs(g[:, c:c + 1] - pt[c:c + 1, :])
                l1_all = d if l1_all is None else l1_all + d
                if c in _CT_COST_CHANNELS:
                    cost = d if cost is None else cost + d

            row = lax.broadcasted_iota(jnp.int32, (M, N), 0)
            cost = jnp.where(row >= nb, 1e6, cost)      # mask invalid GT rows

            mn = jnp.min(cost, axis=0, keepdims=True)                      # (1, N)
            idx = jnp.min(jnp.where(cost <= mn, row, M), axis=0,
                          keepdims=True)                                    # first argmin
            onehot = (row == idx).astype(jnp.float32)                       # (M, N)
            vmask = (mn < ct_thresh).astype(jnp.float32)                    # (1, N)
            umask = 1.0 - vmask

            # Matched-GT HAS_OBJECT gathered along lanes via the one-hot rows.
            t_obj = jnp.sum(onehot * g[:, HAS_OBJECT:HAS_OBJECT + 1], axis=0,
                            keepdims=True)                                  # (1, N)
            x_obj = pt[HAS_OBJECT:HAS_OBJECT + 1, :]                        # (1, N)

            cls_num = cls_num + jnp.sum(_focal_elem(x_obj, t_obj) * vmask)
            cls_den = cls_den + jnp.sum(vmask)

            # Matched-row L1 via one-hot selection of the shared pairwise terms.
            reg_num = reg_num + jnp.sum(onehot * l1_all * vmask)
            reg_den = reg_den + jnp.sum(vmask) * n_reg

            fp_num = fp_num + jnp.sum(
                _focal_elem(x_obj, jnp.zeros_like(x_obj)) * umask)
            fp_den = fp_den + jnp.sum(umask)

        # Guarded denominators: empty match / empty non-match sets give 0, not NaN.
        out_ref[l, 0] = cls_num / jnp.maximum(cls_den, 1.0)
        out_ref[l, 1] = reg_num / jnp.maximum(reg_den, 1.0)
        out_ref[l, 2] = fp_num / jnp.maximum(fp_den, 1.0)


# ---------------------------------------------------------------------------
# pallas_call builders (cached per shape / static params, wrapped in jit)
# ---------------------------------------------------------------------------
@functools.lru_cache(maxsize=None)
def _build_hungarian_cost_fn(L, B, M, N, C, cls_w, reg_w, use_normalized):
    kernel = functools.partial(_hungarian_cost_kernel, cls_w=cls_w,
                               reg_w=reg_w, use_normalized=use_normalized)
    fn = pl.pallas_call(
        kernel,
        out_shape=jax.ShapeDtypeStruct((L, B, M, N), jnp.float32),
        grid=(L, B),
        in_specs=[pl.BlockSpec((1, M, C), lambda l, b: (b, 0, 0)),
                  pl.BlockSpec((1, 1, C, N), lambda l, b: (l, b, 0, 0))],
        out_specs=pl.BlockSpec((1, 1, M, N), lambda l, b: (l, b, 0, 0)),
        compiler_params=pltpu.CompilerParams(
            dimension_semantics=("parallel", "parallel")),
    )
    return jax.jit(fn)


@functools.lru_cache(maxsize=None)
def _build_decoder_losses_fn(L, R, C):
    fn = pl.pallas_call(
        _decoder_losses_kernel,
        out_shape=jax.ShapeDtypeStruct((L, 3), jnp.float32),
        in_specs=[pl.BlockSpec(memory_space=pltpu.MemorySpace.VMEM),
                  pl.BlockSpec(memory_space=pltpu.MemorySpace.VMEM),
                  pl.BlockSpec(memory_space=pltpu.MemorySpace.VMEM)],
        out_specs=pl.BlockSpec(memory_space=pltpu.MemorySpace.SMEM),
    )
    return jax.jit(fn)


@functools.lru_cache(maxsize=None)
def _build_ct_losses_fn(Lc, B, M, N, C, ct_thresh):
    kernel = functools.partial(_ct_losses_kernel, ct_thresh=ct_thresh)
    fn = pl.pallas_call(
        kernel,
        out_shape=jax.ShapeDtypeStruct((Lc, 3), jnp.float32),
        in_specs=[pl.BlockSpec(memory_space=pltpu.MemorySpace.SMEM),
                  pl.BlockSpec(memory_space=pltpu.MemorySpace.VMEM),
                  pl.BlockSpec(memory_space=pltpu.MemorySpace.VMEM)],
        out_specs=pl.BlockSpec(memory_space=pltpu.MemorySpace.SMEM),
    )
    return jax.jit(fn)


# ---------------------------------------------------------------------------
# Host-side assignment (matches the original .detach().cpu().numpy() path)
# ---------------------------------------------------------------------------
def _assign(cost_np):
    if _lsa is not None:
        return _lsa(cost_np)
    # TODO(synk): greedy fallback approximates Hungarian when scipy is missing.
    c = cost_np.copy().astype(np.float64)
    pairs = []
    for _ in range(min(c.shape)):
        i, j = np.unravel_index(np.argmin(c), c.shape)
        pairs.append((int(i), int(j)))
        c[i, :] = np.inf
        c[:, j] = np.inf
    pairs.sort()
    return (np.array([p[0] for p in pairs], dtype=np.int64),
            np.array([p[1] for p in pairs], dtype=np.int64))


# ---------------------------------------------------------------------------
# Loss module
# ---------------------------------------------------------------------------
class Sparse4DLossWithDAC:
    def __init__(self, layer_loss_weights, xrel_range=(-100.0, 100.0),
                 yrel_range=(-20.0, 20.0), use_normalized_motion_cost=False,
                 ct_cost_thresh=10.0, ct_cls_loss_weight=0.1):
        self.layer_loss_weights = layer_loss_weights
        self.xrel_range = xrel_range
        self.yrel_range = yrel_range
        self.use_normalized_motion_cost = use_normalized_motion_cost
        self.ct_cost_thresh = ct_cost_thresh
        self.ct_cls_loss_weight = ct_cls_loss_weight
        self.matching_history = {}
        self.epoch = 0
        self.update_epoch(0)

    def update_epoch(self, epoch):
        self.epoch = epoch
        self.regression_cost_weight = max(0.5, float(np.exp(-epoch / 100.0)) - 0.05)
        self.cls_cost_weight = 1.0 - self.regression_cost_weight

    def reset_matching_history(self):
        self.matching_history = {}

    def get_latest_matching_indices(self, layer_idx):
        if layer_idx not in self.matching_history:
            return []
        return self.matching_history[layer_idx][-1]

    def __call__(self, gt_trajs, outputs, c_outputs=None, step_idx=0,
                 mode='train'):
        gt = jnp.asarray(gt_trajs, jnp.float32)
        gt_np = np.asarray(gt)
        B, M, C = gt.shape
        L = len(outputs)

        preds = jnp.stack([jnp.asarray(p, jnp.float32) for p in outputs], 0)  # (L,B,N,C)
        N = preds.shape[2]
        preds_t = jnp.transpose(preds, (0, 1, 3, 2))  # one transpose for ALL layers

        valid_gt_nbs = (gt_np[..., HAS_OBJECT] == 1.0).sum(axis=1).astype(np.int32)
        losses = {}

        # ------------- decoder layers: fused Hungarian cost (1 launch, 1 sync)
        cost_fn = _build_hungarian_cost_fn(
            L, B, M, N, C,
            float(self.cls_cost_weight), float(self.regression_cost_weight),
            bool(self.use_normalized_motion_cost))
        cost_all = np.asarray(cost_fn(gt, preds_t))            # (L, B, M, N)

        gt_reordered = np.zeros((L, B, N, C), dtype=np.float32)
        matched_mask = np.zeros((L, B, N), dtype=np.float32)
        num_positive = np.zeros((L,), dtype=np.int64)
        for l in range(L):
            layer_indices = []
            for b in range(B):
                gi, pi = _assign(cost_all[l, b])
                k = min(int(valid_gt_nbs[b]), len(gi))
                gi, pi = gi[:k], pi[:k]
                layer_indices.append((gi, pi))
                gt_reordered[l, b, pi] = gt_np[b, gi]
                matched_mask[l, b, pi] = 1.0
                num_positive[l] += len(pi)
            if mode == 'val' and step_idx == 0:
                self.matching_history.setdefault(l, []).append(layer_indices)

        # ------------- all decoder-layer loss reductions in one launch
        R = B * N
        dec_fn = _build_decoder_losses_fn(L, R, C)
        dec = dec_fn(preds.reshape(L, R, C),
                     jnp.asarray(gt_reordered.reshape(L, R, C)),
                     jnp.asarray(matched_mask.reshape(L, R, 1)))   # (L, 3)

        for l in range(L):
            w = float(self.layer_loss_weights[l])
            if l == 0 and num_positive[l] > 0:
                obj = dec[l, 1]          # positive-only focal (layer 0 override)
            else:
                obj = dec[l, 0]          # full focal obj loss
            losses[f'layer_{l}_obj_loss'] = obj * w
            if num_positive[l] > 0:
                losses[f'layer_{l}_reg_loss'] = dec[l, 2] * w

        # ------------- cross-attention decoder: fused one-to-N match + losses
        if c_outputs is not None and len(c_outputs) > 0:
            Lc = len(c_outputs)
            preds_c = jnp.stack([jnp.asarray(p, jnp.float32) for p in c_outputs], 0)
            preds_c_t = jnp.transpose(preds_c, (0, 1, 3, 2))       # (Lc,B,C,N)
            ct_fn = _build_ct_losses_fn(Lc, B, M, N, C, float(self.ct_cost_thresh))
            ct = ct_fn(jnp.asarray(valid_gt_nbs, jnp.int32), gt, preds_c_t)  # (Lc,3)
            for l in range(Lc):
                w = float(self.layer_loss_weights[l])
                losses[f'layer_{l}_cls_loss_ct'] = ct[l, 0] * (w * self.ct_cls_loss_weight)
                losses[f'layer_{l}_reg_loss_ct'] = ct[l, 1] * w
                losses[f'layer_{l}_fp_cls_loss_ct'] = ct[l, 2] * (w * self.ct_cls_loss_weight)

        losses['loss'] = sum(losses.values())
        return losses


# ---------------------------------------------------------------------------
# Demo
# ---------------------------------------------------------------------------
if __name__ == "__main__":
    B, M, N, C = 2, 8, 16, END_OF_INDEX

    key = jax.random.PRNGKey(0)
    kg, k0, k1, kc0, kc1, kn = jax.random.split(key, 6)

    gt = jax.random.uniform(kg, (B, M, C), minval=-3.0, maxval=3.0,
                            dtype=jnp.float32)
    has = np.zeros((B, M), dtype=np.float32)
    has[0, :5] = 1.0
    has[1, :3] = 1.0
    gt = gt.at[..., HAS_OBJECT].set(jnp.asarray(has))

    outputs = [
        jax.random.uniform(k0, (B, N, C), minval=-3.0, maxval=3.0, dtype=jnp.float32),
        jax.random.uniform(k1, (B, N, C), minval=-3.0, maxval=3.0, dtype=jnp.float32),
    ]

    noise = 0.1 * jax.random.normal(kn, (B, 3, C), dtype=jnp.float32)
    c_outputs = []
    for kc in (kc0, kc1):
        base = jax.random.uniform(kc, (B, N, C), minval=-3.0, maxval=3.0,
                                  dtype=jnp.float32)
        base = base.at[:, :3, :].set(gt[:, :3, :] + noise)   # guaranteed matches
        base = base.at[:, N - 4:, X].add(25.0)               # guaranteed non-matches
        c_outputs.append(base)

    loss_mod = Sparse4DLossWithDAC(layer_loss_weights=[0.5, 1.0])
    losses = loss_mod(gt, outputs, c_outputs)
    jax.block_until_ready(losses['loss'])
    assert np.isfinite(float(losses['loss']))
    print("KERNEL_OK")
</pallas_src>

<mosaic_0001>
module attributes {stable_mosaic.version = 11 : i64} {
  func.func @_hungarian_cost_kernel(%arg0: i32, %arg1: i32, %arg2: memref<1x8x12xf32, #tpu.memory_space<vmem>>, %arg3: memref<1x1x12x16xf32, #tpu.memory_space<vmem>>, %arg4: memref<1x1x8x16xf32, #tpu.memory_space<vmem>>) attributes {dimension_semantics = [#tpu.dimension_semantics<parallel>, #tpu.dimension_semantics<parallel>], iteration_bounds = array<i64: 2, 2>, scalar_prefetch = 0 : i64, scratch_operands = 0 : i64, tpu.core_type = #tpu.core_type<tc>, window_params = [{transform_indices = @transform_0, window_bounds = array<i64: 1, 8, 12>}, {transform_indices = @transform_1, window_bounds = array<i64: 1, 1, 12, 16>}, {transform_indices = @transform_2, window_bounds = array<i64: 1, 1, 8, 16>}]} {
    %c0 = arith.constant 0 : index
    %c0_0 = arith.constant 0 : index
    %c0_1 = arith.constant 0 : index
    %0 = vector.load %arg2[%c0, %c0_0, %c0_1] : memref<1x8x12xf32, #tpu.memory_space<vmem>>, vector<1x8x12xf32>
    %1 = vector.shape_cast %0 : vector<1x8x12xf32> to vector<8x12xf32>
    %c0_2 = arith.constant 0 : index
    %c0_3 = arith.constant 0 : index
    %c0_4 = arith.constant 0 : index
    %c0_5 = arith.constant 0 : index
    %2 = vector.load %arg3[%c0_2, %c0_3, %c0_4, %c0_5] : memref<1x1x12x16xf32, #tpu.memory_space<vmem>>, vector<1x1x12x16xf32>
    %3 = vector.shape_cast %2 : vector<1x1x12x16xf32> to vector<12x16xf32>
    %4 = vector.extract_strided_slice %1 {offsets = [0, 0], sizes = [8, 1], strides = [1, 1]} : vector<8x12xf32> to vector<8x1xf32>
    %5 = vector.extract_strided_slice %3 {offsets = [0, 0], sizes = [1, 16], strides = [1, 1]} : vector<12x16xf32> to vector<1x16xf32>
    %6 = vector.broadcast %4 : vector<8x1xf32> to vector<8x16xf32>
    %7 = vector.broadcast %5 : vector<1x16xf32> to vector<8x16xf32>
    %8 = arith.subf %6, %7 : vector<8x16xf32>
    %9 = math.absf %8 : vector<8x16xf32>
    %cst = arith.constant 0.699999988 : f32
    %10 = vector.broadcast %cst : f32 to vector<8x16xf32>
    %11 = arith.mulf %9, %10 : vector<8x16xf32>
    %12 = vector.extract_strided_slice %1 {offsets = [0, 1], sizes = [8, 1], strides = [1, 1]} : vector<8x12xf32> to vector<8x1xf32>
    %13 = vector.extract_strided_slice %3 {offsets = [1, 0], sizes = [1, 16], strides = [1, 1]} : vector<12x16xf32> to vector<1x16xf32>
    %14 = vector.broadcast %12 : vector<8x1xf32> to vector<8x16xf32>
    %15 = vector.broadcast %13 : vector<1x16xf32> to vector<8x16xf32>
    %16 = arith.subf %14, %15 : vector<8x16xf32>
    %17 = math.absf %16 : vector<8x16xf32>
    %cst_6 = arith.constant 0.699999988 : f32
    %18 = vector.broadcast %cst_6 : f32 to vector<8x16xf32>
    %19 = arith.mulf %17, %18 : vector<8x16xf32>
    %20 = arith.addf %11, %19 : vector<8x16xf32>
    %21 = vector.extract_strided_slice %1 {offsets = [0, 2], sizes = [8, 1], strides = [1, 1]} : vector<8x12xf32> to vector<8x1xf32>
    %22 = vector.extract_strided_slice %3 {offsets = [2, 0], sizes = [1, 16], strides = [1, 1]} : vector<12x16xf32> to vector<1x16xf32>
    %23 = vector.broadcast %21 : vector<8x1xf32> to vector<8x16xf32>
    %24 = vector.broadcast %22 : vector<1x16xf32> to vector<8x16xf32>
    %25 = arith.subf %23, %24 : vector<8x16xf32>
    %26 = math.absf %25 : vector<8x16xf32>
    %cst_7 = arith.constant 0.699999988 : f32
    %27 = vector.broadcast %cst_7 : f32 to vector<8x16xf32>
    %28 = arith.mulf %26, %27 : vector<8x16xf32>
    %29 = arith.addf %20, %28 : vector<8x16xf32>
    %30 = vector.extract_strided_slice %1 {offsets = [0, 3], sizes = [8, 1], strides = [1, 1]} : vector<8x12xf32> to vector<8x1xf32>
    %31 = vector.extract_strided_slice %3 {offsets = [3, 0], sizes = [1, 16], strides = [1, 1]} : vector<12x16xf32> to vector<1x16xf32>
    %32 = vector.broadcast %30 : vector<8x1xf32> to vector<8x16xf32>
    %33 = vector.broadcast %31 : vector<1x16xf32> to vector<8x16xf32>
    %34 = arith.subf %32, %33 : vector<8x16xf32>
    %35 = math.absf %34 : vector<8x16xf32>
    %cst_8 = arith.constant 2.000000e-01 : f32
    %36 = vector.broadcast %cst_8 : f32 to vector<8x16xf32>
    %37 = arith.mulf %35, %36 : vector<8x16xf32>
    %38 = arith.addf %29, %37 : vector<8x16xf32>
    %39 = vector.extract_strided_slice %1 {offsets = [0, 4], sizes = [8, 1], strides = [1, 1]} : vector<8x12xf32> to vector<8x1xf32>
    %40 = vector.extract_strided_slice %3 {offsets = [4, 0], sizes = [1, 16], strides = [1, 1]} : vector<12x16xf32> to vector<1x16xf32>
    %41 = vector.broadcast %39 : vector<8x1xf32> to vector<8x16xf32>
    %42 = vector.broadcast %40 : vector<1x16xf32> to vector<8x16xf32>
    %43 = arith.subf %41, %42 : vector<8x16xf32>
    %44 = math.absf %43 : vector<8x16xf32>
    %cst_9 = arith.constant 2.000000e-01 : f32
    %45 = vector.broadcast %cst_9 : f32 to vector<8x16xf32>
    %46 = arith.mulf %44, %45 : vector<8x16xf32>
    %47 = arith.addf %38, %46 : vector<8x16xf32>
    %48 = vector.extract_strided_slice %1 {offsets = [0, 5], sizes = [8, 1], strides = [1, 1]} : vector<8x12xf32> to vector<8x1xf32>
    %49 = vector.extract_strided_slice %3 {offsets = [5, 0], sizes = [1, 16], strides = [1, 1]} : vector<12x16xf32> to vector<1x16xf32>
    %50 = vector.broadcast %48 : vector<8x1xf32> to vector<8x16xf32>
    %51 = vector.broadcast %49 : vector<1x16xf32> to vector<8x16xf32>
    %52 = arith.subf %50, %51 : vector<8x16xf32>
    %53 = math.absf %52 : vector<8x16xf32>
    %cst_10 = arith.constant 1.000000e-01 : f32
    %54 = vector.broadcast %cst_10 : f32 to vector<8x16xf32>
    %55 = arith.mulf %53, %54 : vector<8x16xf32>
    %56 = arith.addf %47, %55 : vector<8x16xf32>
    %57 = vector.extract_strided_slice %1 {offsets = [0, 6], sizes = [8, 1], strides = [1, 1]} : vector<8x12xf32> to vector<8x1xf32>
    %58 = vector.extract_strided_slice %3 {offsets = [6, 0], sizes = [1, 16], strides = [1, 1]} : vector<12x16xf32> to vector<1x16xf32>
    %59 = vector.broadcast %57 : vector<8x1xf32> to vector<8x16xf32>
    %60 = vector.broadcast %58 : vector<1x16xf32> to vector<8x16xf32>
    %61 = arith.subf %59, %60 : vector<8x16xf32>
    %62 = math.absf %61 : vector<8x16xf32>
    %cst_11 = arith.constant 1.000000e-01 : f32
    %63 = vector.broadcast %cst_11 : f32 to vector<8x16xf32>
    %64 = arith.mulf %62, %63 : vector<8x16xf32>
    %65 = arith.addf %56, %64 : vector<8x16xf32>
    %66 = vector.extract_strided_slice %1 {offsets = [0, 7], sizes = [8, 1], strides = [1, 1]} : vector<8x12xf32> to vector<8x1xf32>
    %67 = vector.extract_strided_slice %3 {offsets = [7, 0], sizes = [1, 16], strides = [1, 1]} : vector<12x16xf32> to vector<1x16xf32>
    %68 = vector.broadcast %66 : vector<8x1xf32> to vector<8x16xf32>
    %69 = vector.broadcast %67 : vector<1x16xf32> to vector<8x16xf32>
    %70 = arith.subf %68, %69 : vector<8x16xf32>
    %71 = math.absf %70 : vector<8x16xf32>
    %cst_12 = arith.constant 1.000000e-01 : f32
    %72 = vector.broadcast %cst_12 : f32 to vector<8x16xf32>
    %73 = arith.mulf %71, %72 : vector<8x16xf32>
    %74 = arith.addf %65, %73 : vector<8x16xf32>
    %75 = vector.extract_strided_slice %3 {offsets = [8, 0], sizes = [1, 16], strides = [1, 1]} : vector<12x16xf32> to vector<1x16xf32>
    %76 = arith.negf %75 : vector<1x16xf32>
    %77 = math.exp %76 : vector<1x16xf32>
    %cst_13 = arith.constant 1.000000e+00 : f32
    %78 = vector.broadcast %cst_13 : f32 to vector<1x16xf32>
    %79 = arith.addf %78, %77 : vector<1x16xf32>
    %80 = arith.divf %78, %79 : vector<1x16xf32>
    %81 = arith.mulf %80, %80 : vector<1x16xf32>
    %cst_14 = arith.constant 7.500000e-01 : f32
    %82 = vector.broadcast %cst_14 : f32 to vector<1x16xf32>
    %83 = arith.mulf %82, %81 : vector<1x16xf32>
    %cst_15 = arith.constant 0.000000e+00 : f32
    %84 = vector.broadcast %cst_15 : f32 to vector<1x16xf32>
    %85 = arith.maximumf %75, %84 : vector<1x16xf32>
    %86 = math.absf %75 : vector<1x16xf32>
    %cst_16 = arith.constant 0.000000e+00 : f32
    %87 = vector.broadcast %cst_16 : f32 to vector<1x16xf32>
    %88 = arith.subf %87, %86 : vector<1x16xf32>
    %89 = math.exp %88 : vector<1x16xf32>
    %cst_17 = arith.constant 1.000000e+00 : f32
    %90 = vector.broadcast %cst_17 : f32 to vector<1x16xf32>
    %91 = arith.addf %90, %89 : vector<1x16xf32>
    %92 = math.log %91 : vector<1x16xf32>
    %93 = arith.addf %85, %92 : vector<1x16xf32>
    %94 = arith.mulf %83, %93 : vector<1x16xf32>
    %cst_18 = arith.constant 1.000000e+00 : f32
    %95 = vector.broadcast %cst_18 : f32 to vector<1x16xf32>
    %96 = arith.subf %95, %80 : vector<1x16xf32>
    %cst_19 = arith.constant 1.000000e+00 : f32
    %97 = vector.broadcast %cst_19 : f32 to vector<1x16xf32>
    %98 = arith.subf %97, %80 : vector<1x16xf32>
    %99 = arith.mulf %96, %98 : vector<1x16xf32>
    %cst_20 = arith.constant 2.500000e-01 : f32
    %100 = vector.broadcast %cst_20 : f32 to vector<1x16xf32>
    %101 = arith.mulf %100, %99 : vector<1x16xf32>
    %cst_21 = arith.constant 0.000000e+00 : f32
    %102 = vector.broadcast %cst_21 : f32 to vector<1x16xf32>
    %103 = arith.subf %102, %75 : vector<1x16xf32>
    %cst_22 = arith.constant 0.000000e+00 : f32
    %104 = vector.broadcast %cst_22 : f32 to vector<1x16xf32>
    %105 = arith.maximumf %103, %104 : vector<1x16xf32>
    %106 = math.absf %103 : vector<1x16xf32>
    %cst_23 = arith.constant 0.000000e+00 : f32
    %107 = vector.broadcast %cst_23 : f32 to vector<1x16xf32>
    %108 = arith.subf %107, %106 : vector<1x16xf32>
    %109 = math.exp %108 : vector<1x16xf32>
    %cst_24 = arith.constant 1.000000e+00 : f32
    %110 = vector.broadcast %cst_24 : f32 to vector<1x16xf32>
    %111 = arith.addf %110, %109 : vector<1x16xf32>
    %112 = math.log %111 : vector<1x16xf32>
    %113 = arith.addf %105, %112 : vector<1x16xf32>
    %114 = arith.mulf %101, %113 : vector<1x16xf32>
    %115 = vector.extract_strided_slice %1 {offsets = [0, 8], sizes = [8, 1], strides = [1, 1]} : vector<8x12xf32> to vector<8x1xf32>
    %cst_25 = arith.constant 5.000000e-01 : f32
    %116 = vector.broadcast %cst_25 : f32 to vector<8x1xf32>
    %117 = arith.cmpf ogt, %115, %116 : vector<8x1xf32>
    %118 = vector.shape_cast %117 : vector<8x1xi1> to vector<8x1xi1>
    %119 = vector.broadcast %118 : vector<8x1xi1> to vector<8x16xi1>
    %120 = vector.shape_cast %114 : vector<1x16xf32> to vector<1x16xf32>
    %121 = vector.broadcast %120 : vector<1x16xf32> to vector<8x16xf32>
    %122 = vector.shape_cast %94 : vector<1x16xf32> to vector<1x16xf32>
    %123 = vector.broadcast %122 : vector<1x16xf32> to vector<8x16xf32>
    %124 = arith.select %119, %121, %123 : vector<8x16xi1>, vector<8x16xf32>
    %cst_26 = arith.constant 5.000000e-02 : f32
    %125 = vector.broadcast %cst_26 : f32 to vector<8x16xf32>
    %126 = arith.mulf %124, %125 : vector<8x16xf32>
    %cst_27 = arith.constant 0.949999988 : f32
    %127 = vector.broadcast %cst_27 : f32 to vector<8x16xf32>
    %128 = arith.mulf %74, %127 : vector<8x16xf32>
    %129 = arith.addf %126, %128 : vector<8x16xf32>
    %c0_28 = arith.constant 0 : index
    %c0_29 = arith.constant 0 : index
    %c0_30 = arith.constant 0 : index
    %c0_31 = arith.constant 0 : index
    %130 = vector.load %arg4[%c0_28, %c0_29, %c0_30, %c0_31] : memref<1x1x8x16xf32, #tpu.memory_space<vmem>>, vector<1x1x8x16xf32>
    %131 = vector.shape_cast %130 : vector<1x1x8x16xf32> to vector<8x16xf32>
    %132 = vector.shape_cast %129 : vector<8x16xf32> to vector<1x1x8x16xf32>
    tpu.vector_store %arg4[%c0_28, %c0_29, %c0_30, %c0_31], %132 {strides = array<i32>} : memref<1x1x8x16xf32, #tpu.memory_space<vmem>>, vector<1x1x8x16xf32>,
    return
  }
  func.func @transform_0(%arg0: i32, %arg1: i32) -> (i32, i32, i32) {
    %c0_i32 = arith.constant 0 : i32
    %c0_i32_0 = arith.constant 0 : i32
    %c0_i32_1 = arith.constant 0 : i32
    return %arg1, %c0_i32, %c0_i32_0 : i32, i32, i32
  }
  func.func @transform_1(%arg0: i32, %arg1: i32) -> (i32, i32, i32, i32) {
    %c0_i32 = arith.constant 0 : i32
    %c0_i32_0 = arith.constant 0 : i32
    %c0_i32_1 = arith.constant 0 : i32
    return %arg0, %arg1, %c0_i32, %c0_i32_0 : i32, i32, i32, i32
  }
  func.func @transform_2(%arg0: i32, %arg1: i32) -> (i32, i32, i32, i32) {
    %c0_i32 = arith.constant 0 : i32
    %c0_i32_0 = arith.constant 0 : i32
    %c0_i32_1 = arith.constant 0 : i32
    return %arg0, %arg1, %c0_i32, %c0_i32_0 : i32, i32, i32, i32
  }
}

</mosaic_0001>

<bundles_post_ra>
// kernel: tpu_custom_call.1
= control target key start
LH: loop header
LB: loop body
LE: loop exit
PB: predicated region body
PF: predicated region fallthrough
CT: control target
= control target key end

     0   :  { %7 = vsyncpa [#allocation3], 0  ;;  %s835_s0 = inlined_call_operand.vmem [shape: f32[2,8,12], index: 0, kind: input, shape index: {}]   ;;  %s836_s1 = inlined_call_operand.vmem [shape: f32[2,2,12,16], index: 1, kind: input, shape index: {}]   ;;  %s837_s2 = inlined_call_operand.hbm [shape: f32[2,2,8,16], index: 2, kind: output, shape index: {}]  }
   0x1   :  { %9 = vsyncpa [#allocation3 + $0x1], 0  ;;  %s683_s9 = smov 0   ;;  %s685_s10 = smov 0  }
   0x2   :  { %s687_s11 = smov 0   ;;  %s689_s12 = smov 0  }
   0x3   :  { %s691_s13 = smov 0   ;;  %s693_s14 = smov 0  }
   0x4   :  { %s695_s15 = smov 0   ;;  %s697_s16 = smov 0  }
   0x5 LB: > { %s447_s17 = sadd.s32 4294967295, %s656_s16   ;;  %s448_s18 = sadd.s32 4294967294, %s656_s16   ;;  %s656_s16 = sphi %s697_s16, %s15_s16   ;;  %s652_s15 = sphi %s695_s15, %s846_s15   ;;  %s648_s14 = sphi %s693_s14, %s845_s14   ;;  %s644_s13 = sphi %s691_s13, %s844_s13   ;;  %s640_s12 = sphi %s689_s12, %s843_s12   ;;  %s636_s11 = sphi %s687_s11, %s842_s11   ;;  %s632_s10 = sphi %s685_s10, %s841_s10   ;;  %s628_s9 = sphi %s683_s9, %s840_s9  }
   0x6   : > { %s24_s19 = sadd.s32 1, %s648_s14  ;;  %s27_s20 = sadd.s32 1, %s652_s15 }
   0x7   : > { %p25_p0 = scmp.ge.s32.totalorder %s24_s19, 2  ;;  %p100_p1 = scmp.ne.s32.totalorder %s636_s11, %s632_s10 }
   0x8   : > { %p101_p2 = scmp.eq.s32.totalorder %s447_s17, 3  ;;  %p106_p5 = scmp.ne.s32.totalorder %s632_s10, %s628_s9 }
   0x9   : > { %s848_s19 = smov (%p25_p0, %s24_s19), 0  ;;  %s850_s20 = smov (!%p25_p0, %s27_s20), %s652_s15 }
   0xa   : > { %s86_s21 = ssub.s32 %s648_s14, %s848_s19  ;;  %p734_p3 = por %p101_p2, %p100_p1 }
   0xb   : > { %p29_p4 = scmp.ge.s32.totalorder %s850_s20, 2  ;;  %p107_p6 = scmp.eq.s32.totalorder %s448_s18, 3 }
   0xc   : > { %p451_p7 = scmp.ge.s32.totalorder %s656_s16, 1  ;;  %p144_p9 = scmp.lt.s32.totalorder %s656_s16, 5 }
   0xd   : > { %s852_s20 = smov (%p29_p4, %s850_s20), 0  ;;  %p743_p8 = por %p107_p6, %p106_p5 }
   0xe   : > { %s85_s24 = ssub.s32 %s652_s15, %s852_s20  ;;  %s90_s25 = sadd.s32 1, %s636_s11 }
   0xf   : > { %s87_s26 = sor.u32 %s86_s21, %s85_s24  ;;  %p145_p10 = pnand %p451_p7, %p144_p9 }
  0x10   : > { %p88_p11 = scmp.eq.s32.totalorder %s87_s26, 0  ;;  %p174_p12 = scmp.lt.s32.totalorder (!%p145_p10), %s640_s12, 1 }
  0x11   : > { %148 = sbr.rel (%p145_p10) target bundleno = 196 (0xc4), region = 28  ;;  %p178_p13 = scmp.lt.s32.totalorder (!%p145_p10), %s644_s13, 1 }
  0x12   : > { %s752_s27 = scalar_select %p88_p11, %s636_s11, %s90_s25  }
  0x13   : > { %s171_s25 = sand.u32 (!%p145_p10), 1, %s632_s10  }
  0x14   : > { %s452_s26 = sshll.u32 (!%p145_p10), %s171_s25, 3 }
  0x15   : > { %s173_s3 = scalar_lea.vmem (!%p145_p10), [#allocation2], %s452_s26 }
  0x16   : > { %v658_v0 = vmov 2   ;;  %v659_v1 = vmov 0   ;;  %s756_s28 = scalar_select %p174_p12, %s640_s12, 1  ;;  %v660_v3 = vmov 3   ;;  %v661_v4 = vmov 1  }
  0x17   : > { %545 = vset.pattern.permute.xlu1 %v658_v0  ;;  %543 = vset.pattern.permute.xlu0 %v659_v1  ;;  %v662_v5 = vmov 4   ;;  %v663_v6 = vmov 5   ;;  %v664_v8 = vmov 6   ;;  %v665_v9 = vmov 8   ;;  %s179_s5 = scalar_select %p178_p13, %s644_s13, 1 }
  0x18   : > { %s453_s29 = sshll.u32 %s756_s28, 3  ;;  %v666_v10 = vmov 7   ;;  %s454_s6 = sshll.u32 %s756_s28, 1  ;;  %v195_v25 = vlaneseq  ;;  %vm336_vm2 = vcmask 130048  }
  0x19   : > { %s177_s4 = scalar_lea.vmem %s835_s0, %s453_s29  ;;  %s455_s7 = sshll.u32 %s179_s5, 2 }
  0x1a   : > { %v187_v2 = vld [vmem:[%s177_s4] sm:$0xff]  ;;  %s184_s8 = sadd.s32 %s455_s7, %s454_s6  ;;  %v773_v27 = vshrl.u32 %v195_v25, 7  ;;  %s459_s28 = sshll.u32 %s644_s13, 1 }
  0x1b   : > { %215 = vperm.xlu1 %545, %v187_v2   ;;  %192 = vperm.xlu0 %543, %v187_v2   ;;  %vm318_vm0 = vcmp.gt.f32.partialorder %v187_v2, 0.5  ;;  %s456_s17 = sshll.u32 %s184_s8, 3  ;;  %s350_s29 = sadd.s32 %s640_s12, %s459_s28 }
  0x1c   : > { %v319_v7 = vsel %vm318_vm0, 1, %v659_v1  ;;  %s186_s24 = scalar_lea.vmem %s836_s1, %s456_s17  ;;  %v776_v28 = vsub.s32 0, %v773_v27  ;;  %v220_v29 = vsub.s32 2, %v773_v27  ;;  %v232_v32 = vsub.s32 3, %v773_v27  ;;  %s460_s30 = sshll.u32 %s350_s29, 7 }
  0x1d   : > { %v768_v11 = vld [vmem:[%s186_s24 + $0x8] sm:$0xf]  ;;  %v188_v30 = vld [vmem:[%s186_s24] sm:$0xff]  ;;  %v208_v33 = vsub.s32 1, %v773_v27  ;;  %v244_v38 = vsub.s32 4, %v773_v27  ;;  %v256_v39 = vsub.s32 5, %v773_v27  ;;  %s352_s7 = scalar_lea.hbm %s837_s2, %s460_s30 }
  0x1e   : > { %v307_v12 = vsub.f32 0.0, %v768_v11  ;;  %v295_v13 = vand.u32 2147483647, %v768_v11  ;;  %v457_v15 = vmul.f32 -1.442695, %v768_v11  ;;  %v198_v31 = vrot.slane %v188_v30, %v776_v28  ;;  %s354_s4 = sshll.u32 %s173_s3, 4  ;;  %s355_s4 = int_to_ptr.vmem [resolvable:$true] %s354_s4 }
  0x1f   : > { %546 = vset.pattern.permute.xlu1 %v660_v3  ;;  %544 = vset.pattern.permute.xlu0 %v661_v4  ;;  %v221_v35 = vrot.slane %v188_v30, %v220_v29  ;;  %v233_v41 = vrot.slane %v188_v30, %v232_v32  ;;  %v209_v42 = vrot.slane %v188_v30, %v208_v33  ;;  %v268_v51 = vsub.s32 6, %v773_v27  ;;  %s339_s13 = scalar_lea.sflag [#allocation3], %s171_s25  ;;  %s564_s8 = scalar_lea.vmem %s355_s4, 128 }
  0x20   : > { %227 = vperm.xlu1 %546, %v187_v2   ;;  %203 = vperm.xlu0 %544, %v187_v2   ;;  %v309_v14 = vand.u32 2147483647, %v307_v12  ;;  %v296_v16 = vsub.f32 0.0, %v295_v13  ;;  %552 = vpow2.f32 %v457_v15  ;;  %v245_v49 = vrot.slane %v188_v30, %v244_v38  ;;  %p565_p0 = scmp.ne.s32.totalorder %s355_s4, %s564_s8  ;;  %s667_s12 = smov [#allocation2]  }
  0x21   : > { %v257_v50 = vrot.slane %v188_v30, %v256_v39  ;;  %v294_v55 = vmax.f32 %v768_v11, 0.0  ;;  %v308_v59 = vmax.f32 %v307_v12, 0.0  ;;  %v269_v4 = vrot.slane %v188_v30, %v268_v51  ;;  %s568_s17 = sshll.u32 %s667_s12, 4  ;;  %s569_s17 = int_to_ptr.vmem [resolvable:$false] %s568_s17 }
  0x22   : > { %v310_v17 = vsub.f32 0.0, %v309_v14  ;;  %v297_v18 = vmul.f32 1.442695, %v296_v16  ;;  %v280_v15 = vsub.s32 7, %v773_v27  ;;  %p566_p1 = pnand %p565_p0, %p734_p3  ;;  %s570_s18 = scalar_lea.vmem %s569_s17, 256 }
  0x23   : > { %p571_p4 = scmp.lt.s32.totalorder %s355_s4, %s569_s17  ;;  %p572_p5 = scmp.lt.s32.totalorder %s570_s18, %s564_s8 }
  0x24   : > { %547 = vset.pattern.permute.xlu1 %v662_v5  ;;  %548 = vset.pattern.permute.xlu0 %v663_v6  ;;  %v311_v19 = vmul.f32 1.442695, %v310_v17  ;;  %554 = vpow2.f32 %v297_v18  ;;  %v281_v25 = vrot.slane %v188_v30, %v280_v15  ;;  %p567_p2 = pneg %p566_p1 }
  0x25   : > { %239 = vperm.xlu1 %547, %v187_v2   ;;  %251 = vperm.xlu0 %548, %v187_v2   ;;  %p573_p6 = por %p572_p5, %p571_p4 }
  0x26   : > { %556 = vpow2.f32 %v311_v19 }
  0x27   : > { %p574_p7 = pnand %p573_p6, %p567_p2 }
  0x29   : > { %549 = vset.pattern.permute.xlu1 %v664_v8  ;;  %551 = vset.pattern.permute.xlu0 %v665_v9 }
  0x2a   : > { %263 = vperm.xlu1 %549, %v187_v2   ;;  %321 = vperm.xlu0 %551, %v319_v7  }
  0x2d   : > { %v553_v20 = vpop.eup %552 }
  0x2e   : > { %550 = vset.pattern.permute.xlu1 %v666_v10  ;;  %v289_v21 = vadd.f32 1.0, %v553_v20 }
  0x2f   : > { %275 = vperm.xlu1 %550, %v187_v2  }
  0x30   : > { %558 = vrcp.f32 %v289_v21 }
  0x31   : > { %v555_v22 = vpop.eup %554 }
  0x32   : > { %v299_v24 = vadd.f32 1.0, %v555_v22 }
  0x33   : > { %v557_v23 = vpop.eup %556 }
  0x34   : > { %v313_v26 = vadd.f32 1.0, %v557_v23  ;;  %560 = vlog2.f32 %v299_v24 }
  0x36   : > { %562 = vlog2.f32 %v313_v26 }
  0x3d   : > { %v559_v34 = vpop.eup %558 }
  0x3e   : > { %v304_v43 = vsub.f32 1.0, %v559_v34  ;;  %v292_v56 = vmul.f32 %v559_v34, %v559_v34 }
  0x40   : > { %v305_v58 = vmul.f32 %v304_v43, %v304_v43  ;;  %v293_v7 = vmul.f32 0.75, %v292_v56 }
  0x41   : > { %v561_v44 = vpop.eup %560 }
  0x42   : > { %v301_v57 = vmul.f32 0.6931472, %v561_v44  ;;  %v306_v8 = vmul.f32 0.25, %v305_v58 }
  0x43   : > { %v563_v46 = vpop.eup %562 }
  0x44   : > { %v315_v62 = vmul.f32 0.6931472, %v563_v46  ;;  %v302_v11 = vadd.f32 %v301_v57, %v294_v55 }
  0x46   : > { %v316_v13 = vadd.f32 %v315_v62, %v308_v59  ;;  %v303_v22 = vmul.f32 %v302_v11, %v293_v7 }
  0x48   : > { %v317_v23 = vmul.f32 %v316_v13, %v306_v8  ;;  %v331_v27 = vrot.slane %v303_v22, %v776_v28 }
  0x4a   : > { %v327_v33 = vrot.slane %v317_v23, %v776_v28 }
  0x96   : > { %v216_v36 = vpop.permute.xlu1 %215  ;;  %v193_v37 = vpop.permute.xlu0 %192 }
  0x97   : > { %v199_v40 = vsub.f32 %v193_v37, %v198_v31  ;;  %v222_v45 = vsub.f32 %v216_v36, %v221_v35 }
  0x99   : > { %v200_v52 = vand.u32 2147483647, %v199_v40  ;;  %v223_v60 = vand.u32 2147483647, %v222_v45 }
  0x9b   : > { %v228_v47 = vpop.permute.xlu1 %227  ;;  %v204_v48 = vpop.permute.xlu0 %203  ;;  %v201_v63 = vmul.f32 0.7, %v200_v52  ;;  %v224_v9 = vmul.f32 0.7, %v223_v60 }
  0x9c   : > { %v234_v53 = vsub.f32 %v228_v47, %v233_v41  ;;  %v210_v54 = vsub.f32 %v204_v48, %v209_v42 }
  0x9e   : > { %v211_v61 = vand.u32 2147483647, %v210_v54  ;;  %v235_v0 = vand.u32 2147483647, %v234_v53 }
  0xa0   : > { %v212_v1 = vmul.f32 0.7, %v211_v61  ;;  %v240_v2 = vpop.permute.xlu1 %239  ;;  %v252_v3 = vpop.permute.xlu0 %251  ;;  %v236_v16 = vmul.f32 0.2, %v235_v0 }
  0xa1   : > { %v246_v5 = vsub.f32 %v240_v2, %v245_v49  ;;  %v258_v6 = vsub.f32 %v252_v3, %v257_v50 }
  0xa2   : > { %v213_v10 = vadd.f32 %v212_v1, %v201_v63 }
  0xa3   : > { %v247_v14 = vand.u32 2147483647, %v246_v5  ;;  %v259_v12 = vand.u32 2147483647, %v258_v6 }
  0xa4   : > { %v225_v17 = vadd.f32 %v224_v9, %v213_v10 }
  0xa5   : > { %v248_v18 = vmul.f32 0.2, %v247_v14  ;;  %v264_v19 = vpop.permute.xlu1 %263  ;;  %v260_v24 = vmul.f32 0.1, %v259_v12  ;;  %v322_v31 = vpop.permute.xlu0 %321 }
  0xa6   : > { %v237_v20 = vadd.f32 %v236_v16, %v225_v17  ;;  %v270_v21 = vsub.f32 %v264_v19, %v269_v4  ;;  %vm323_vm1 = vcmp.eq.s32.totalorder %v322_v31, 1 }
  0xa7   : > { %v332_v38 = vsel %vm323_vm1, %v327_v33, %v331_v27 }
  0xa8   : > { %v249_v26 = vadd.f32 %v248_v18, %v237_v20  ;;  %v271_v29 = vand.u32 2147483647, %v270_v21  ;;  %v333_v41 = vmul.f32 0.05, %v332_v38 }
  0xaa   : > { %v276_v32 = vpop.permute.xlu1 %275  ;;  %v261_v34 = vadd.f32 %v260_v24, %v249_v26  ;;  %v272_v35 = vmul.f32 0.1, %v271_v29 }
  0xab   : > { %v282_v36 = vsub.f32 %v276_v32, %v281_v25 }
  0xac   : > { %v273_v39 = vadd.f32 %v272_v35, %v261_v34 }
  0xad   : > { %v283_v37 = vand.u32 2147483647, %v282_v36 }
  0xaf   : > { %v284_v30 = vmul.f32 0.1, %v283_v37 }
  0xb1   : > { %v285_v40 = vadd.f32 %v284_v30, %v273_v39 }
  0xb3   : > { %v334_v42 = vmul.f32 0.95, %v285_v40 }
  0xb5   : > { %v335_v28 = vadd.f32 %v334_v42, %v333_v41 }
  0xb7   : > { %337 = vst.msk [vmem:[%s173_s3] sm:$0xff] %vm336_vm2, %v335_v28 }
  0xb8   : > { %577 = shalt.err (!%p574_p7)
}
  0xb9   : > { %s578_s21 = scalar_lea.hbm %s352_s7, 128  ;;  %s582_s26 = scalar_lea.hbm %s837_s2, 512 }
  0xba   : > { %p579_p9 = scmp.ne.s32.totalorder %s352_s7, %s578_s21  ;;  %p583_p12 = scmp.lt.s32.totalorder %s352_s7, %s837_s2 }
  0xbb   : > { %p584_p13 = scmp.lt.s32.totalorder %s582_s26, %s578_s21 }
  0xbc   : > { %p580_p10 = pnand %p579_p9, %p734_p3 }
  0xbd   : > { %p585_p0 = por %p584_p13, %p583_p12 }
  0xbe   : > { %p581_p11 = pneg %p580_p10 }
  0xc0   : > { %p586_p1 = pnand %p585_p0, %p581_p11 }
  0xc2   : > { %589 = shalt.err (!%p586_p1)
}
  0xc3   : > { %463 = dma.vmem_to_hbm [thread:$0]  (%p734_p3), %s355_s4, 128, %s352_s7, %s339_s13  }
  0xc4 PF: > { %p469_p2 = scmp.ge.s32.totalorder %s656_s16, 2  ;;  %s366_s30 = sand.u32 1, %s628_s9  }
  0xc5   : > { %s367_s3 = scalar_lea.sflag [#allocation3], %s366_s30 }
  0xc6   : > { %p466_p4 = pnand %p469_p2, %p743_p8 }
  0xc8   : > { %p467_p5 = pneg %p466_p4 }
  0xca   : > { %623 = dma.done.wait (%p467_p5), %s367_s3, 128  }
  0xcb   : > { %625 = vsyncadd (%p467_p5), %s367_s3, 4294967168  ;;  %s15_s16 = sadd.s32 1, %s656_s16   ;;  %s840_s9 = smov %s632_s10 }
  0xcc   : > { %p12_p6 = scmp.ge.s32.totalorder %s15_s16, 6   ;;  %s841_s10 = smov %s636_s11 }
  0xcd   : > { %s842_s11 = smov %s752_s27  ;;  %s843_s12 = smov %s648_s14 }
  0xce   : > { %s844_s13 = smov %s652_s15  ;;  %s845_s14 = smov %s848_s19 }
  0xcf   : > { %s846_s15 = smov %s852_s20  ;;  %14 = sbr.rel (!%p12_p6) target bundleno = 5 (0x5), region = 66 }
  0xd4   :  { %372 = vsyncpa [#allocation3], 1 }
  0xd5   :  { %374 = vsyncpa [#allocation3 + $0x1], 1 }

</bundles_post_ra>
